<compile_context>
chip_gen: v6e
topology: v6e:2x2x1
jax: 0.10.0
libtpu: 0.0.40
codegen_flags: <defaults>
</compile_context>

<pallas_src>
import functools

import numpy as np
import jax
import jax.numpy as jnp
from jax.experimental import pallas as pl
from jax.experimental.pallas import tpu as pltpu


# ---------------------------------------------------------------------------
# Kernel
# ---------------------------------------------------------------------------
def _spiking_avgpool_kernel(x_ref, p_ref, v_ref, v_out_ref, s_out_ref, sc_ref,
                            *, inv_k, v_th):
    """One grid step = one tile of `mt` flattened rows.

    x_ref     : (mt, Dx)  contiguous rows of x viewed as (M, R*kh*W)   [VMEM]
    p_ref     : (Dx, F)   block-diagonal 0/1 pooling matrix            [VMEM]
    v_ref     : (mt, F)   membrane potential (aliased with v_out)      [VMEM]
    v_out_ref : (mt, F)   updated membrane potential                   [VMEM]
    s_out_ref : (mt, F)   emitted spikes (0/1), bf16 by default        [VMEM]
    sc_ref    : (1, 1)    per-block partial of sum(|x|)                [SMEM]
    """
    x = x_ref[...]

    # spikecount partial for this block (summed in the wrapper -> no
    # cross-grid-step dependency, the grid axis stays "parallel").
    sc_ref[0, 0] = jnp.sum(jnp.abs(x))

    # avg_pool2d: both window reductions AND the packing of R pooled rows into
    # one lane-dense row are folded into a single MXU matmul against a 0/1
    # block-diagonal matrix; scale by 1/K afterwards (sum-then-scale, as in
    # F.avg_pool2d).  The MXU is otherwise idle, so this overlaps the DMAs.
    pooled = jnp.dot(x, p_ref[...], preferred_element_type=jnp.float32) * inv_k

    # IF-neuron membrane update (alpha is None branch).
    v_new = v_ref[...] + pooled
    plus = (v_new >= v_th).astype(jnp.float32)
    v_out_ref[...] = v_new - plus
    s_out_ref[...] = plus.astype(s_out_ref.dtype)


# ---------------------------------------------------------------------------
# Trace-time helpers (all pure Python / numpy; shapes are static under jit)
# ---------------------------------------------------------------------------
def _divisors(n):
    ds = set()
    i = 1
    while i * i <= n:
        if n % i == 0:
            ds.add(i)
            ds.add(n // i)
        i += 1
    return ds


def _choose_group(M3, Wo):
    """Number R of consecutive pooled rows packed into one lane-dense row.

    Smallest divisor R of M3 with R*Wo >= 128 lanes (prefer an exact multiple
    of 128 if it does not more than double R); this bounds the MXU work at
    ~max(Wo, 128) MACs per input element while giving unmasked, full-width
    stores for the state regardless of batch size.
    """
    divs = sorted(_divisors(M3))
    ok = [r for r in divs if r * Wo >= 128]
    if not ok:
        return divs[-1]            # cannot reach 128 lanes; take the widest view
    r0 = ok[0]
    mult = [r for r in ok if (r * Wo) % 128 == 0 and r <= 2 * r0]
    return mult[0] if mult else r0


def _pool_matrix(kh, kw, W, Wo, R):
    """Block-diagonal 0/1 matrix: R copies of the (kh*W, Wo) pooling block.

    Columns w >= Wo*kw (the W-sliver that F.avg_pool2d floor-crops) map to
    nothing, so the full-W input rows can be streamed unmodified.
    """
    base = np.zeros((kh * W, Wo), np.float32)
    for i in range(kh):
        for wo in range(Wo):
            base[i * W + wo * kw: i * W + wo * kw + kw, wo] = 1.0
    p = np.zeros((R * kh * W, R * Wo), np.float32)
    for r in range(R):
        p[r * kh * W:(r + 1) * kh * W, r * Wo:(r + 1) * Wo] = base
    return p


def _vmem_plan():
    """(vmem_limit_bytes, double-buffered working-set budget) for this chip."""
    cap = 64 * 1024 * 1024                       # conservative default (v7x-sized)
    try:
        info = pltpu.get_tpu_info()
        cap = int(getattr(info, "vmem_capacity_bytes", cap))
    except Exception:
        pass
    limit = int(min(100 * 2**20, 0.75 * cap))    # 96 MiB on v5e/v6e, 48 MiB on v7x
    budget = int(min(0.6 * limit, 40 * 2**20))
    return limit, budget


def _choose_row_tile(M, row_bytes, fixed_bytes, budget):
    """Largest sublane tile mt (divisor of M, multiple of 8 or == M) whose
    double-buffered streams fit `budget`; prefer >= 2 grid blocks when the
    problem is big enough (keeps both v7x TensorCores busy)."""
    divs = sorted(d for d in _divisors(M) if d % 8 == 0 or d == M)
    avail = max(budget - fixed_bytes, row_bytes)
    fits = [d for d in divs if d * row_bytes <= avail] or [divs[0]]
    want_blocks = 2 if M >= 16 else 1
    pref = [d for d in fits if M // d >= want_blocks] or fits
    return max(pref)


# ---------------------------------------------------------------------------
# Jitted step
# ---------------------------------------------------------------------------
@functools.partial(jax.jit, static_argnames=("kh", "kw", "v_th", "spike_dtype"))
def _spiking_avgpool_step(x, v, *, kh, kw, v_th, spike_dtype):
    """x: (B, C, H, W) NCHW; v: (B, C, Ho, Wo) float32.

    Returns (v_new, spikes, sum(|x|)) with v_new/spikes shaped (B, C, Ho, Wo).
    """
    x = x.astype(jnp.float32)
    B, C, H, W = x.shape
    Ho, Wo = H // kh, W // kw
    K = kh * kw

    # F.avg_pool2d floor-crops rows that do not form a full window, but
    # spikecount sums |x| over the FULL input: account for the H-sliver here
    # (the W-sliver stays inside the kernel's x view and is summed there; the
    # pooling matrix simply ignores it).  No-op for divisible shapes.
    sc_extra = jnp.float32(0.0)
    if H != Ho * kh:
        sc_extra = jnp.sum(jnp.abs(x[:, :, Ho * kh:, :]))
        x = x[:, :, :Ho * kh, :]

    M3 = B * C * Ho                       # pooled rows in NCHW order
    R = _choose_group(M3, Wo)             # pooled rows packed per lane-dense row
    M = M3 // R
    Dx = R * kh * W                       # input row length  (pure reshape of NCHW)
    F = R * Wo                            # output row length (pure reshape of NCHW)

    x_view = x.reshape(M, Dx)                        # bitcast, no data movement
    v_view = v.astype(jnp.float32).reshape(M, F)     # bitcast, no data movement
    p = jnp.asarray(_pool_matrix(kh, kw, W, Wo, R))  # trace-time constant

    s_itemsize = jnp.dtype(spike_dtype).itemsize
    vmem_limit, budget = _vmem_plan()
    # Honest per-row working set: x + v_in + v_out + spikes, double-buffered.
    row_bytes = 2 * (Dx * 4 + F * 4 + F * 4 + F * s_itemsize)
    fixed_bytes = 2 * Dx * F * 4                     # resident pooling matrix
    mt = _choose_row_tile(M, row_bytes, fixed_bytes, budget)
    grid = (M // mt,)

    kernel = functools.partial(_spiking_avgpool_kernel, inv_k=1.0 / K, v_th=v_th)
    cost = pl.CostEstimate(
        flops=int(2 * M * Dx * F + 6 * M * F),
        transcendentals=0,
        bytes_accessed=int(4 * M * Dx + 4 * Dx * F + 8 * M * F
                           + s_itemsize * M * F + 4 * grid[0]),
    )

    state_spec = pl.BlockSpec((mt, F), lambda i: (i, 0))
    v_new, s_new, sc_part = pl.pallas_call(
        kernel,
        out_shape=(
            jax.ShapeDtypeStruct((M, F), jnp.float32),        # v_new
            jax.ShapeDtypeStruct((M, F), spike_dtype),        # spikes
            jax.ShapeDtypeStruct((grid[0], 1), jnp.float32),  # |x| partials
        ),
        grid=grid,
        in_specs=[
            pl.BlockSpec((mt, Dx), lambda i: (i, 0)),   # x rows (contiguous DMA)
            pl.BlockSpec((Dx, F), lambda i: (0, 0)),    # pooling matrix (resident)
            state_spec,                                 # v
        ],
        out_specs=(
            state_spec,                                 # v_new
            state_spec,                                 # spikes
            pl.BlockSpec((1, 1), lambda i: (i, 0),
                         memory_space=pltpu.MemorySpace.SMEM),
        ),
        input_output_aliases={2: 0},                    # v updated in place
        compiler_params=pltpu.CompilerParams(
            dimension_semantics=("parallel",),
            vmem_limit_bytes=vmem_limit,
        ),
        cost_estimate=cost,
    )(x_view, p, v_view)

    shape4 = (B, C, Ho, Wo)
    return (v_new.reshape(shape4), s_new.reshape(shape4),
            jnp.sum(sc_part) + sc_extra)


# ---------------------------------------------------------------------------
# Stateful wrapper (API parity with the PyTorch module)
# ---------------------------------------------------------------------------
class SpikingAvgPool:
    """JAX/Pallas port of the PyTorch SpikingAvgPool module.

    State (membrane potential `v`, last spikes `out`) is stored in the logical
    NCHW shape; every layout change used by the kernel is a pure reshape of a
    contiguous array (zero data movement).  Spikes are stored as bfloat16 by
    default (values are exactly 0/1, so this is lossless); pass
    spike_dtype=jnp.float32 for strict dtype parity with PyTorch.
    """

    def __init__(self, out_shape, kernel_size, batch_size, init_mem=0.0,
                 spike_dtype=jnp.bfloat16):
        # out_shape is (C, Ho, Wo); buffers are (B, C, Ho, Wo) as in PyTorch.
        self.out_shape = (batch_size,) + tuple(out_shape)
        if isinstance(kernel_size, int):
            kernel_size = (kernel_size, kernel_size)
        self.kernel_size = tuple(kernel_size)
        self.v_th = 1.0
        self.alpha = None
        self.init_mem = float(init_mem)
        self.spike_dtype = spike_dtype
        # Kept for API parity with the PyTorch module (set but unused in forward).
        self.spikecount_multiplier = float(np.prod(self.kernel_size))
        self.step = 0
        self.spikecount = jnp.float32(0.0)
        self.v = jnp.zeros(self.out_shape, jnp.float32)      # membrane potential
        self.out = jnp.zeros(self.out_shape, self.spike_dtype)  # last spikes

    def reset(self, batch_size=None):
        if batch_size is not None:
            self.out_shape = (batch_size,) + self.out_shape[1:]
            self.out = jnp.zeros(self.out_shape, self.spike_dtype)
        self.v = jnp.full(self.out_shape, self.init_mem, jnp.float32)
        self.spikecount = jnp.float32(0.0)

    def forward(self, x):
        """x: (B, C, H, W) float NCHW. Returns previous-step spikes (B, C, Ho, Wo)."""
        self.step += 1
        prev = self.out                    # previous spikes; no copy needed in JAX
        kh, kw = self.kernel_size
        v_new, out_new, sc = _spiking_avgpool_step(
            x, self.v, kh=kh, kw=kw, v_th=self.v_th, spike_dtype=self.spike_dtype)
        self.v = v_new
        self.out = out_new
        self.spikecount = self.spikecount + sc
        return prev

    def get_count(self):
        return self.spikecount

    # TODO(synk): set_membrane uses masked_scatter_ (in-place boolean scatter);
    # not needed for the forward pass and left unimplemented.


# ---------------------------------------------------------------------------
# Self-check
# ---------------------------------------------------------------------------
if __name__ == "__main__":
    B, C, H, W = 2, 4, 16, 16
    k = 2
    Ho, Wo = H // k, W // k

    mod = SpikingAvgPool(out_shape=(C, Ho, Wo), kernel_size=k, batch_size=B)

    key = jax.random.PRNGKey(0)
    k1, k2 = jax.random.split(key)
    # Inputs quantized to multiples of 1/8 in [0, 2): pooled sums and membrane
    # potentials are then exact dyadics, so the threshold comparison is
    # bit-identical between the kernel and the plain-JAX reference.
    x1 = jnp.floor(jax.random.uniform(k1, (B, C, H, W), jnp.float32) * 16.0) / 8.0
    x2 = jnp.floor(jax.random.uniform(k2, (B, C, H, W), jnp.float32) * 16.0) / 8.0

    prev1 = mod.forward(x1)
    prev2 = mod.forward(x2)
    jax.block_until_ready((prev1, prev2, mod.v, mod.out, mod.spikecount))

    # --- plain-JAX reference ---
    def ref_pool(x):
        return x.reshape(B, C, Ho, k, Wo, k).mean(axis=(3, 5))

    v = jnp.zeros((B, C, Ho, Wo), jnp.float32)
    out = jnp.zeros_like(v)
    sc = jnp.float32(0.0)
    prevs = []
    for x in (x1, x2):
        prevs.append(out)
        sc = sc + jnp.sum(jnp.abs(x))
        v = v + ref_pool(x)
        plus = (v >= 1.0).astype(jnp.float32)
        v = v - plus
        out = plus

    assert jnp.allclose(prev1.astype(jnp.float32), prevs[0], atol=1e-6)
    assert jnp.allclose(prev2.astype(jnp.float32), prevs[1], atol=1e-6)
    assert jnp.allclose(mod.v, v, atol=1e-5)
    assert jnp.allclose(mod.out.astype(jnp.float32), out, atol=1e-6)
    assert jnp.allclose(mod.spikecount, sc, rtol=1e-4)

    print("KERNEL_OK")
</pallas_src>

<mosaic_0001>
module attributes {stable_mosaic.version = 11 : i64} {
  func.func @_spiking_avgpool_kernel(%arg0: i32, %arg1: memref<4x512xf32, #tpu.memory_space<vmem>>, %arg2: memref<512x128xf32, #tpu.memory_space<vmem>>, %arg3: memref<4x128xf32, #tpu.memory_space<vmem>>, %arg4: memref<4x128xf32, #tpu.memory_space<vmem>>, %arg5: memref<4x128xbf16, #tpu.memory_space<vmem>>, %arg6: memref<1x1xf32, #tpu.memory_space<smem>>) attributes {dimension_semantics = [#tpu.dimension_semantics<parallel>], iteration_bounds = array<i64: 1>, scalar_prefetch = 0 : i64, scratch_operands = 0 : i64, tpu.core_type = #tpu.core_type<tc>, window_params = [{transform_indices = @transform_0, window_bounds = array<i64: 4, 512>}, {pipeline_mode = #tpu.pipeline_mode<synchronous>, transform_indices = @transform_1, window_bounds = array<i64: 512, 128>}, {transform_indices = @transform_2, window_bounds = array<i64: 4, 128>}, {transform_indices = @transform_3, window_bounds = array<i64: 4, 128>}, {transform_indices = @transform_4, window_bounds = array<i64: 4, 128>}, {transform_indices = @transform_5, window_bounds = array<i64: 1, 1>}]} {
    %c0 = arith.constant 0 : index
    %c0_0 = arith.constant 0 : index
    %0 = vector.load %arg1[%c0, %c0_0] : memref<4x512xf32, #tpu.memory_space<vmem>>, vector<4x512xf32>
    %1 = math.absf %0 : vector<4x512xf32>
    %2 = vector.shape_cast %1 : vector<4x512xf32> to vector<1x4x512xf32>
    %cst = arith.constant dense<0.000000e+00> : vector<1xf32>
    %3 = vector.multi_reduction <add>, %2, %cst [1, 2] : vector<1x4x512xf32> to vector<1xf32>
    %4 = vector.shape_cast %3 : vector<1xf32> to vector<1x1x1xf32>
    %5 = vector.extract %4[0, 0, 0] : f32 from vector<1x1x1xf32>
    %c0_1 = arith.constant 0 : index
    %c0_2 = arith.constant 0 : index
    %6 = memref.load %arg6[%c0_1, %c0_2] : memref<1x1xf32, #tpu.memory_space<smem>>
    memref.store %5, %arg6[%c0_1, %c0_2] : memref<1x1xf32, #tpu.memory_space<smem>>
    %c0_3 = arith.constant 0 : index
    %c0_4 = arith.constant 0 : index
    %7 = vector.load %arg2[%c0_3, %c0_4] : memref<512x128xf32, #tpu.memory_space<vmem>>, vector<512x128xf32>
    %cst_5 = arith.constant dense<0.000000e+00> : vector<4x128xf32>
    %8 = tpu.matmul %0, %7, %cst_5 {dimension_numbers = #tpu.dot_dimension_numbers<[1], [0], [0], [1], [0, 0, 1, 1], [], []>} : vector<4x512xf32>, vector<512x128xf32>, vector<4x128xf32> -> vector<4x128xf32>
    %cst_6 = arith.constant 2.500000e-01 : f32
    %9 = vector.broadcast %cst_6 : f32 to vector<4x128xf32>
    %10 = arith.mulf %8, %9 : vector<4x128xf32>
    %c0_7 = arith.constant 0 : index
    %c0_8 = arith.constant 0 : index
    %11 = vector.load %arg3[%c0_7, %c0_8] : memref<4x128xf32, #tpu.memory_space<vmem>>, vector<4x128xf32>
    %12 = arith.addf %11, %10 : vector<4x128xf32>
    %cst_9 = arith.constant 1.000000e+00 : f32
    %13 = vector.broadcast %cst_9 : f32 to vector<4x128xf32>
    %14 = arith.cmpf oge, %12, %13 : vector<4x128xf32>
    %15 = arith.extui %14 : vector<4x128xi1> to vector<4x128xi32>
    %16 = arith.sitofp %15 : vector<4x128xi32> to vector<4x128xf32>
    %17 = arith.subf %12, %16 : vector<4x128xf32>
    %c0_10 = arith.constant 0 : index
    %c0_11 = arith.constant 0 : index
    %18 = vector.load %arg4[%c0_10, %c0_11] : memref<4x128xf32, #tpu.memory_space<vmem>>, vector<4x128xf32>
    tpu.vector_store %arg4[%c0_10, %c0_11], %17 {strides = array<i32>} : memref<4x128xf32, #tpu.memory_space<vmem>>, vector<4x128xf32>,
    %19 = arith.truncf %16 : vector<4x128xf32> to vector<4x128xbf16>
    %c0_12 = arith.constant 0 : index
    %c0_13 = arith.constant 0 : index
    %20 = vector.load %arg5[%c0_12, %c0_13] : memref<4x128xbf16, #tpu.memory_space<vmem>>, vector<4x128xbf16>
    tpu.vector_store %arg5[%c0_12, %c0_13], %19 {strides = array<i32>} : memref<4x128xbf16, #tpu.memory_space<vmem>>, vector<4x128xbf16>,
    return
  }
  func.func @transform_0(%arg0: i32) -> (i32, i32) {
    %c0_i32 = arith.constant 0 : i32
    %c0_i32_0 = arith.constant 0 : i32
    return %arg0, %c0_i32 : i32, i32
  }
  func.func @transform_1(%arg0: i32) -> (i32, i32) {
    %c0_i32 = arith.constant 0 : i32
    %c0_i32_0 = arith.constant 0 : i32
    %c0_i32_1 = arith.constant 0 : i32
    return %c0_i32, %c0_i32_0 : i32, i32
  }
  func.func @transform_2(%arg0: i32) -> (i32, i32) {
    %c0_i32 = arith.constant 0 : i32
    %c0_i32_0 = arith.constant 0 : i32
    return %arg0, %c0_i32 : i32, i32
  }
  func.func @transform_3(%arg0: i32) -> (i32, i32) {
    %c0_i32 = arith.constant 0 : i32
    %c0_i32_0 = arith.constant 0 : i32
    return %arg0, %c0_i32 : i32, i32
  }
  func.func @transform_4(%arg0: i32) -> (i32, i32) {
    %c0_i32 = arith.constant 0 : i32
    %c0_i32_0 = arith.constant 0 : i32
    return %arg0, %c0_i32 : i32, i32
  }
  func.func @transform_5(%arg0: i32) -> (i32, i32) {
    %c0_i32 = arith.constant 0 : i32
    %c0_i32_0 = arith.constant 0 : i32
    return %arg0, %c0_i32 : i32, i32
  }
}

</mosaic_0001>

<bundles_post_ra>
// kernel: _spiking_avgpool_step.1
= control target key start
LH: loop header
LB: loop body
LE: loop exit
PB: predicated region body
PF: predicated region fallthrough
CT: control target
= control target key end

     0   :  { %11 = vsyncpa [#allocation3], 0  ;;  %s475_s0 = inlined_call_operand.vmem [shape: f32[4,512], index: 0, kind: input, shape index: {}]   ;;  %s476_s1 = inlined_call_operand.hbm [shape: f32[512,128], index: 1, kind: input, shape index: {}]   ;;  %s477_s2 = inlined_call_operand.vmem [shape: f32[4,128], index: 2, kind: input, shape index: {}, may-alias: {2,3}]   ;;  %s478_s3 = inlined_call_operand.vmem [shape: f32[4,128], index: 3, kind: output, shape index: {0}, may-alias: {2,3}]   ;;  %s479_s4 = inlined_call_operand.vmem [shape: bf16[4,128], index: 4, kind: output, shape index: {1}]   ;;  %s480_s5 = inlined_call_operand.hbm [shape: f32[1,1], index: 5, kind: output, shape index: {2}]  }
   0x1   :  { %12 = vsyncpa [#allocation4], 0  ;;  %s415_s18 = smov [#allocation2]  }
   0x2   :  { %s20_s19 = sshll.u32 %s415_s18, 4  ;;  %s21_s19 = int_to_ptr.vmem [resolvable:$true] %s20_s19 }
   0x3   :  { %s391_s20 = scalar_lea.vmem %s21_s19, 8192  ;;  %p396_p1 = scmp.lt.s32.totalorder %s21_s19, %s21_s19 }
   0x4   :  { %p392_p0 = scmp.ne.s32.totalorder %s21_s19, %s391_s20  ;;  %p397_p2 = scmp.lt.s32.totalorder %s391_s20, %s391_s20 }
   0x6   :  { %p398_p3 = por %p397_p2, %p396_p1 }
   0x8   :  { %p399_p4 = pnand %p398_p3, %p392_p0 }
   0xa   :  { %402 = shalt.err (!%p399_p4)
}
   0xb   :  { %s416_s21 = smov 128   ;;  %s417_s22 = smov 8  }
   0xc   :  { %26 = dma.hbm_to_vmem [thread:$0]  %s476_s1, 8192, %s21_s19, [#allocation3], %s416_s21, %s416_s21, %s417_s22  }
   0xd   :  { %411 = dma.done.wait [#allocation3], 8192  }
   0xe   :  { %412 = vsyncadd [#allocation3], 4294959104  ;;  %v92_v0 = vld [vmem:[#allocation2 + $0xf8] sm:$0xff]  ;;  %v91_v4 = vld [vmem:[#allocation2 + $0xf0] sm:$0xff]  ;;  %vm42_vm0 = vcmask 1043456   ;;  %s418_s30 = smov [#allocation5]  }
   0xf   :  { %v124_v1 = vld [vmem:[#allocation2 + $0x1f8] sm:$0xff]  ;;  %304 = vmatprep.subr.mxu0 %v92_v0  ;;  %v123_v5 = vld [vmem:[#allocation2 + $0x1f0] sm:$0xff]  ;;  %v90_v8 = vld [vmem:[#allocation2 + $0xe8] sm:$0xff] }
  0x10   :  { %v76_v2 = vld [vmem:[#allocation2 + $0x78] sm:$0xff]  ;;  %339 = vmatprep.subr.mxu1 %v124_v1  ;;  %v75_v6 = vld [vmem:[#allocation2 + $0x70] sm:$0xff]  ;;  %v122_v9 = vld [vmem:[#allocation2 + $0x1e8] sm:$0xff] }
  0x11   :  { %v108_v3 = vld [vmem:[#allocation2 + $0x178] sm:$0xff]  ;;  %305 = vmatpush3.msra.mxu0 %v76_v2  ;;  %v107_v7 = vld [vmem:[#allocation2 + $0x170] sm:$0xff]  ;;  %v74_v10 = vld [vmem:[#allocation2 + $0x68] sm:$0xff] }
  0x12   :  { %340 = vmatpush3.msra.mxu1 %v108_v3  ;;  %306 = vmatprep.subr.mxu0 %v91_v4  ;;  %v106_v11 = vld [vmem:[#allocation2 + $0x168] sm:$0xff]  ;;  %v89_v12 = vld [vmem:[#allocation2 + $0xe0] sm:$0xff]  ;;  %v88_v16 = vld [vmem:[#allocation2 + $0xd8] sm:$0xff] }
  0x13   :  { %341 = vmatprep.subr.mxu1 %v123_v5  ;;  %307 = vmatpush3.msra.mxu0 %v75_v6  ;;  %v121_v13 = vld [vmem:[#allocation2 + $0x1e0] sm:$0xff]  ;;  %v120_v17 = vld [vmem:[#allocation2 + $0x1d8] sm:$0xff]  ;;  %v87_v20 = vld [vmem:[#allocation2 + $0xd0] sm:$0xff] }
  0x14   :  { %342 = vmatpush3.msra.mxu1 %v107_v7  ;;  %308 = vmatprep.subr.mxu0 %v90_v8  ;;  %v73_v14 = vld [vmem:[#allocation2 + $0x60] sm:$0xff]  ;;  %v72_v18 = vld [vmem:[#allocation2 + $0x58] sm:$0xff]  ;;  %v119_v21 = vld [vmem:[#allocation2 + $0x1d0] sm:$0xff] }
  0x15   :  { %343 = vmatprep.subr.mxu1 %v122_v9  ;;  %v105_v15 = vld [vmem:[#allocation2 + $0x160] sm:$0xff]  ;;  %309 = vmatpush3.msra.mxu0 %v74_v10  ;;  %v104_v19 = vld [vmem:[#allocation2 + $0x158] sm:$0xff]  ;;  %v71_v22 = vld [vmem:[#allocation2 + $0x50] sm:$0xff] }
  0x16   :  { %344 = vmatpush3.msra.mxu1 %v106_v11  ;;  %310 = vmatprep.subr.mxu0 %v89_v12  ;;  %v103_v23 = vld [vmem:[#allocation2 + $0x150] sm:$0xff]  ;;  %v86_v24 = vld [vmem:[#allocation2 + $0xc8] sm:$0xff]  ;;  %v85_v28 = vld [vmem:[#allocation2 + $0xc0] sm:$0xff] }
  0x17   :  { %345 = vmatprep.subr.mxu1 %v121_v13  ;;  %311 = vmatpush3.msra.mxu0 %v73_v14  ;;  %v118_v25 = vld [vmem:[#allocation2 + $0x1c8] sm:$0xff]  ;;  %v117_v29 = vld [vmem:[#allocation2 + $0x1c0] sm:$0xff]  ;;  %v84_v32 = vld [vmem:[#allocation2 + $0xb8] sm:$0xff] }
  0x18   :  { %346 = vmatpush3.msra.mxu1 %v105_v15  ;;  %312 = vmatprep.subr.mxu0 %v88_v16  ;;  %v70_v26 = vld [vmem:[#allocation2 + $0x48] sm:$0xff]  ;;  %v69_v30 = vld [vmem:[#allocation2 + $0x40] sm:$0xff]  ;;  %v116_v33 = vld [vmem:[#allocation2 + $0x1b8] sm:$0xff] }
  0x19   :  { %347 = vmatprep.subr.mxu1 %v120_v17  ;;  %313 = vmatpush3.msra.mxu0 %v72_v18  ;;  %v102_v27 = vld [vmem:[#allocation2 + $0x148] sm:$0xff]  ;;  %v101_v31 = vld [vmem:[#allocation2 + $0x140] sm:$0xff]  ;;  %v68_v34 = vld [vmem:[#allocation2 + $0x38] sm:$0xff] }
  0x1a   :  { %348 = vmatpush3.msra.mxu1 %v104_v19  ;;  %314 = vmatprep.subr.mxu0 %v87_v20  ;;  %v100_v35 = vld [vmem:[#allocation2 + $0x138] sm:$0xff]  ;;  %v83_v36 = vld [vmem:[#allocation2 + $0xb0] sm:$0xff]  ;;  %v82_v40 = vld [vmem:[#allocation2 + $0xa8] sm:$0xff] }
  0x1b   :  { %349 = vmatprep.subr.mxu1 %v119_v21  ;;  %315 = vmatpush3.msra.mxu0 %v71_v22  ;;  %v115_v37 = vld [vmem:[#allocation2 + $0x1b0] sm:$0xff]  ;;  %v114_v41 = vld [vmem:[#allocation2 + $0x1a8] sm:$0xff]  ;;  %v81_v44 = vld [vmem:[#allocation2 + $0xa0] sm:$0xff] }
  0x1c   :  { %350 = vmatpush3.msra.mxu1 %v103_v23  ;;  %316 = vmatprep.subr.mxu0 %v86_v24  ;;  %v67_v38 = vld [vmem:[#allocation2 + $0x30] sm:$0xff]  ;;  %v66_v42 = vld [vmem:[#allocation2 + $0x28] sm:$0xff]  ;;  %v113_v45 = vld [vmem:[#allocation2 + $0x1a0] sm:$0xff] }
  0x1d   :  { %351 = vmatprep.subr.mxu1 %v118_v25  ;;  %317 = vmatpush3.msra.mxu0 %v70_v26  ;;  %v99_v39 = vld [vmem:[#allocation2 + $0x130] sm:$0xff]  ;;  %v98_v43 = vld [vmem:[#allocation2 + $0x128] sm:$0xff]  ;;  %v65_v46 = vld [vmem:[#allocation2 + $0x20] sm:$0xff] }
  0x1e   :  { %352 = vmatpush3.msra.mxu1 %v102_v27  ;;  %318 = vmatprep.subr.mxu0 %v85_v28  ;;  %v97_v47 = vld [vmem:[#allocation2 + $0x120] sm:$0xff]  ;;  %v33_v49 = vld [vmem:[%s475_s0 + $0x8] sm:$0xff]  ;;  %v80_v50 = vld [vmem:[#allocation2 + $0x98] sm:$0xff] }
  0x1f   :  { %353 = vmatprep.subr.mxu1 %v117_v29  ;;  %319 = vmatpush3.msra.mxu0 %v69_v30  ;;  %v32_v48 = vld [vmem:[%s475_s0] sm:$0xff]  ;;  %v112_v51 = vld [vmem:[#allocation2 + $0x198] sm:$0xff]  ;;  %v35_v53 = vand.u32 2147483647, %v33_v49  ;;  %v79_v56 = vld [vmem:[#allocation2 + $0x90] sm:$0xff]  ;;  %v128_v11 = vcombine.high %v33_v49, %v33_v49 }
  0x20   :  { %354 = vmatpush3.msra.mxu1 %v101_v31  ;;  %320 = vmatprep.subr.mxu0 %v84_v32  ;;  %v34_v52 = vand.u32 2147483647, %v32_v48  ;;  %v64_v54 = vld [vmem:[#allocation2 + $0x18] sm:$0xff]  ;;  %v111_v57 = vld [vmem:[#allocation2 + $0x190] sm:$0xff]  ;;  %v78_v63 = vld [vmem:[#allocation2 + $0x88] sm:$0xff]  ;;  %v127_v8 = vcombine.high %v32_v48, %v32_v48  ;;  %v419_v32 = vmov 0.0  }
  0x21   :  { %355 = vmatprep.subr.mxu1 %v116_v33  ;;  %321 = vmatpush3.msra.mxu0 %v68_v34  ;;  %v96_v55 = vld [vmem:[#allocation2 + $0x118] sm:$0xff]  ;;  %v39_v59 = vcombine.high %v35_v53, %v35_v53  ;;  %v63_v61 = vld [vmem:[#allocation2 + $0x10] sm:$0xff]  ;;  %v110_v0 = vld [vmem:[#allocation2 + $0x188] sm:$0xff]  ;;  %v46_v2 = vsel %vm42_vm0, %v35_v53, 0.0 }
  0x22   :  { %356 = vmatpush3.msra.mxu1 %v100_v35  ;;  %322 = vmatprep.subr.mxu0 %v83_v36  ;;  %v38_v58 = vcombine.high %v34_v52, %v34_v52  ;;  %v43_v60 = vsel %vm42_vm0, %v34_v52, 0.0  ;;  %v95_v62 = vld [vmem:[#allocation2 + $0x110] sm:$0xff]  ;;  %v62_v3 = vld [vmem:[#allocation2 + $0x8] sm:$0xff]  ;;  %v77_v6 = vld [vmem:[#allocation2 + $0x80] sm:$0xff] }
  0x23   :  { %357 = vmatprep.subr.mxu1 %v115_v37  ;;  %323 = vmatpush3.msra.mxu0 %v67_v38  ;;  %v94_v4 = vld [vmem:[#allocation2 + $0x108] sm:$0xff]  ;;  %v109_v7 = vld [vmem:[#allocation2 + $0x180] sm:$0xff]  ;;  %v48_v9 = vsel %vm42_vm0, %v39_v59, 0.0 }
  0x24   :  { %358 = vmatpush3.msra.mxu1 %v99_v39  ;;  %324 = vmatprep.subr.mxu0 %v82_v40  ;;  %v44_v1 = vsel %vm42_vm0, %v38_v58, 0.0  ;;  %v61_v10 = vld [vmem:[#allocation2] sm:$0xff] }
  0x25   :  { %359 = vmatprep.subr.mxu1 %v114_v41  ;;  %325 = vmatpush3.msra.mxu0 %v66_v42  ;;  %v45_v5 = vadd.f32 %v44_v1, %v43_v60  ;;  %v93_v13 = vld [vmem:[#allocation2 + $0x100] sm:$0xff] }
  0x26   :  { %360 = vmatpush3.msra.mxu1 %v98_v43  ;;  %326 = vmatprep.subr.mxu0 %v81_v44  ;;  %v272_v29 = vld [vmem:[%s477_s2] sm:$0xf] }
  0x27   :  { %361 = vmatprep.subr.mxu1 %v113_v45  ;;  %327 = vmatpush3.msra.mxu0 %v65_v46  ;;  %v47_v12 = vadd.f32 %v46_v2, %v45_v5 }
  0x28   :  { %362 = vmatpush3.msra.mxu1 %v97_v47  ;;  %328 = vmatprep.subr.mxu0 %v80_v50 }
  0x29   :  { %363 = vmatprep.subr.mxu1 %v112_v51  ;;  %329 = vmatpush3.msra.mxu0 %v64_v54  ;;  %v49_v14 = vadd.f32 %v48_v9, %v47_v12 }
  0x2a   :  { %364 = vmatpush3.msra.mxu1 %v96_v55  ;;  %330 = vmatprep.subr.mxu0 %v79_v56 }
  0x2b   :  { %365 = vmatprep.subr.mxu1 %v111_v57  ;;  %331 = vmatpush3.msra.mxu0 %v63_v61 }
  0x2c   :  { %366 = vmatpush3.msra.mxu1 %v95_v62  ;;  %332 = vmatprep.subr.mxu0 %v78_v63 }
  0x2d   :  { %367 = vmatprep.subr.mxu1 %v110_v0  ;;  %333 = vmatpush3.msra.mxu0 %v62_v3 }
  0x2e   :  { %368 = vmatpush3.msra.mxu1 %v94_v4  ;;  %334 = vmatprep.subr.mxu0 %v77_v6 }
  0x2f   :  { %369 = vmatprep.subr.mxu1 %v109_v7  ;;  %335 = vmatpush3.msra.mxu0 %v61_v10 }
  0x30   :  { %195 = vmatprep.mubr.f32.mxu0 %v127_v8  ;;  %370 = vmatpush3.msra.mxu1 %v93_v13 }
  0x31   :  { %265 = vmatprep.mubr.f32.mxu1 %v128_v11  ;;  %50 = vadd.xlane.f32.xlu0 %v49_v14 }
  0x32   :  { %196 = vmatmul.mubr.f32.vlgmr.msra.gmra.mxu0 %v32_v48  ;;  %266 = vmatmul.mubr.f32.vlgmr.msra.gmra.mxu1 %v33_v49 }
  0xba   :  { %v51_v15 = vpop.xlane.xlu0 %50 }
  0xbb   :  { %v52_v16 = vrot.slane %v51_v15, 4 }
  0xbd   :  { %v53_v17 = vadd.f32 %v52_v16, %v51_v15 }
  0xbf   :  { %v54_v18 = vrot.slane %v53_v17, 2 }
  0xc1   :  { %v55_v19 = vadd.f32 %v54_v18, %v53_v17 }
  0xc3   :  { %v56_v20 = vrot.slane %v55_v19, 1 }
  0xc5   :  { %v57_v21 = vadd.f32 %v56_v20, %v55_v19 }
  0xc7   :  { %374 = vpush %v57_v21 }
  0xf2   :  { %v336_v22 = vpop.f32.mrf.mxu0  ;;  %v371_v23 = vpop.f32.mrf.mxu1 }
  0xf4   :  { %v337_v24 = vpop.f32.mrf.mxu0  ;;  %v372_v26 = vpop.f32.mrf.mxu1 }
  0xf5   :  { %v338_v25 = vadd.f32 %v337_v24, %v336_v22  ;;  %v373_v27 = vadd.f32 %v372_v26, %v371_v23 }
  0xf7   :  { %v268_v28 = vadd.f32 %v373_v27, %v338_v25 }
  0xf8   :  { %s375_s29 = spop %374 }
  0xf9   :  { %v271_v30 = vmul.f32 0.25, %v268_v28  ;;  %60 = sst [smem:[#allocation5]] %s375_s29 }
  0xfa   :  { %292 = dma.smem_to_hbm %s418_s30, 16, %s480_s5, [#allocation4]  }
  0xfb   :  { %v273_v31 = vadd.f32 %v272_v29, %v271_v30 }
  0xfd   :  { %vm274_vm1 = vcmp.ge.f32.partialorder %v273_v31, 1.0 }
  0xfe   :  { %v303_v33 = vsel %vm274_vm1, 1.0, %v419_v32 }
  0xff   :  { %v277_v34 = vsub.f32 %v273_v31, %v303_v33  ;;  %v279_v35 = vpack.c.bf16 %v303_v33, %v303_v33 }
 0x101   :  { %278 = vst [vmem:[%s478_s3] sm:$0xf] %v277_v34  ;;  %280 = vst [vmem:[%s479_s4] sm:$0x3] %v279_v35 }
 0x102   :  { %413 = dma.done.wait [#allocation4], 16  }
 0x103   :  { %414 = vsyncadd [#allocation4], 4294967280 }
 0x104   :  { %300 = sfence }
 0x105   :  { %301 = vsyncpa [#allocation3], 1 }
 0x106   :  { %302 = vsyncpa [#allocation4], 1 }

</bundles_post_ra>
